<compile_context>
chip_gen: v7x
topology: tpu7x:2x2x1
jax: 0.10.0
libtpu: 0.0.40
codegen_flags: <defaults>
</compile_context>

<pallas_src>
import functools

import jax
import jax.numpy as jnp
from jax.experimental import pallas as pl
from jax.experimental.pallas import tpu as pltpu


# --------------------------------------------------------------------------------------
# Parameter preprocessing (pure JAX, runs once per call / trace)
# --------------------------------------------------------------------------------------
def _fold_bn(w, b, gamma, beta, mean, var, eps):
    """Fold eval-mode BatchNorm into conv weight / bias.  w: (C_out, C_in, KH, KW)."""
    scale = gamma / jnp.sqrt(var + eps)                                  # (C_out,)
    w_eff = (w * scale[:, None, None, None]).astype(jnp.float32)
    b_eff = ((b - mean) * scale + beta).astype(jnp.float32)
    return w_eff, b_eff


def _band_weight(w_eff, w_spatial):
    """Fold the KW taps and W-direction zero padding of a KHxKW conv (stride=1, pad=KW//2)
    into a block-banded matrix per KH tap acting on the lane-flattened (W * C_in) axis.

    w_eff: (C_out, C_in, KH, KW) -> (KH, W*C_in, W*C_out) float32
    """
    c_out, c_in, kh_sz, kw_sz = w_eff.shape
    taps = jnp.transpose(w_eff, (2, 3, 1, 0)).astype(jnp.float32)        # (KH, KW, C_in, C_out)
    pad = kw_sz // 2
    bands = []
    for kh in range(kh_sz):
        acc = jnp.zeros((w_spatial * c_in, w_spatial * c_out), jnp.float32)
        for kw in range(kw_sz):
            shift = jnp.eye(w_spatial, k=pad - kw, dtype=jnp.float32)    # (W, W) band
            acc = acc + jnp.kron(shift, taps[kh, kw])
        bands.append(acc)
    return jnp.stack(bands, axis=0)


# --------------------------------------------------------------------------------------
# Pallas kernel: full DoubleConv for nb images, lane-flattened (nb*H, W*C) layout
# --------------------------------------------------------------------------------------
def _double_conv_kernel(x_ref, wA_ref, w2_ref, b_ref, o_ref, *, H, WC_out):
    M = o_ref.shape[0]                               # nb * H rows

    # ---- conv1 (KH taps folded into K) fused with the 1x1 identity branch (widened N) ----
    # ONE (M, 3*WC_in) x (3*WC_in, 2*WC_out) MXU dot; vreg-aligned lane slices split it.
    r = jnp.dot(x_ref[...], wA_ref[...], preferred_element_type=jnp.float32)   # (M, 2*WC_out)
    y1 = jnp.maximum(r[:, :WC_out] + b_ref[0:1, :], 0.0)       # conv1 + BN1 + ReLU
    idn = r[:, WC_out:] + b_ref[2:3, :]                        # 1x1 conv + BN3

    # ---- conv2 (3x3) + BN2: +-1-row shifted operands via XLU roll + zero-halo row masks ----
    # (y1 stays in vregs; per-image masks also stop roll wrap-around between images).
    row = jax.lax.broadcasted_iota(jnp.int32, (M, WC_out), 0)
    y1_dn = jnp.where((row % H) == 0, 0.0, pltpu.roll(y1, shift=1, axis=0))
    y1_up = jnp.where((row % H) == H - 1, 0.0, pltpu.roll(y1, shift=M - 1, axis=0))

    acc2 = b_ref[1:2, :] + jnp.dot(y1_dn.astype(jnp.bfloat16), w2_ref[0],
                                   preferred_element_type=jnp.float32)
    acc2 = acc2 + jnp.dot(y1.astype(jnp.bfloat16), w2_ref[1],
                          preferred_element_type=jnp.float32)
    acc2 = acc2 + jnp.dot(y1_up.astype(jnp.bfloat16), w2_ref[2],
                          preferred_element_type=jnp.float32)

    # ---- residual add + final ReLU, lane-dense (M, WC_out) store -------------------------
    o_ref[...] = jnp.maximum(acc2 + idn, 0.0)


# --------------------------------------------------------------------------------------
# Wrapper
# --------------------------------------------------------------------------------------
def _tensorcores_per_chip():
    try:
        kind = jax.devices()[0].device_kind.lower()
    except Exception:
        return 1
    return 2 if ("v7" in kind or "7x" in kind) else 1


def double_conv(x_nchw, p, *, eps=1e-5):
    B, C_in, H, W = x_nchw.shape
    C_out = p["w1"].shape[0]
    WC_in, WC_out = W * C_in, W * C_out
    K1 = 3 * WC_in

    # Fold BN, build banded weights (tiny one-time work on weights).
    w1e, s1 = _fold_bn(p["w1"], p["b1"], p["g1"], p["be1"], p["m1"], p["v1"], eps)
    w2e, s2 = _fold_bn(p["w2"], p["b2"], p["g2"], p["be2"], p["m2"], p["v2"], eps)
    w3e, s3 = _fold_bn(p["w3"], p["b3"], p["g3"], p["be3"], p["m3"], p["v3"], eps)
    w1b = _band_weight(w1e, W)                               # (3, WC_in,  WC_out)
    w2b = _band_weight(w2e, W)                               # (3, WC_out, WC_out)
    w3b = _band_weight(w3e, W)[0]                            # (WC_in, WC_out)

    # Combined conv1 (KH folded into K) + identity (extra WC_out lanes of N): (3*WC_in, 2*WC_out)
    wA = jnp.zeros((K1, 2 * WC_out), jnp.float32)
    wA = wA.at[0 * WC_in:1 * WC_in, :WC_out].set(w1b[0])
    wA = wA.at[1 * WC_in:2 * WC_in, :WC_out].set(w1b[1])
    wA = wA.at[2 * WC_in:3 * WC_in, :WC_out].set(w1b[2])
    wA = wA.at[1 * WC_in:2 * WC_in, WC_out:].set(w3b)        # identity uses the center window
    wA = wA.astype(jnp.bfloat16)
    w2b = w2b.astype(jnp.bfloat16)
    biases = jnp.stack([jnp.tile(s1, W), jnp.tile(s2, W), jnp.tile(s3, W)], 0)  # (3, WC_out) f32

    # NCHW -> lane-flattened, KH-tap-concatenated (B*H, 3*W*C_in) slab in bf16.
    # TODO(synk): keep activations lane-flattened end-to-end in a real model to drop this.
    x_rows = jnp.transpose(x_nchw, (0, 2, 3, 1)).reshape(B, H, WC_in)
    x_pad = jnp.pad(x_rows, ((0, 0), (1, 1), (0, 0)))
    x_taps = jnp.concatenate([x_pad[:, 0:H], x_pad[:, 1:H + 1], x_pad[:, 2:H + 2]], axis=-1)
    x_taps = x_taps.reshape(B * H, K1).astype(jnp.bfloat16)

    # Grid: one image/step ("parallel") on 2-TC chips (v7x); single collapsed step otherwise.
    nb = 1 if (_tensorcores_per_chip() == 2 and B > 1) else B
    M_blk = nb * H

    kernel = functools.partial(_double_conv_kernel, H=H, WC_out=WC_out)
    out = pl.pallas_call(
        kernel,
        out_shape=jax.ShapeDtypeStruct((B * H, WC_out), jnp.float32),
        grid_spec=pltpu.PrefetchScalarGridSpec(
            num_scalar_prefetch=0,
            grid=(B // nb,),
            in_specs=[
                pl.BlockSpec((M_blk, K1), lambda b: (b, 0)),
                pl.BlockSpec((K1, 2 * WC_out), lambda b: (0, 0)),
                pl.BlockSpec((3, WC_out, WC_out), lambda b: (0, 0, 0)),
                pl.BlockSpec((3, WC_out), lambda b: (0, 0)),
            ],
            out_specs=pl.BlockSpec((M_blk, WC_out), lambda b: (b, 0)),
        ),
        compiler_params=pltpu.CompilerParams(dimension_semantics=("parallel",)),
    )(x_taps, wA, w2b, biases)

    # lane-dense (B*H, W*C_out) -> NCHW to match the PyTorch module's output layout
    return jnp.transpose(out.reshape(B, H, W, C_out), (0, 3, 1, 2))


# --------------------------------------------------------------------------------------
# Pure-JAX reference (HIGHEST precision)
# --------------------------------------------------------------------------------------
def double_conv_ref(x, p, *, eps=1e-5):
    def conv(inp, w, b, pad):
        y = jax.lax.conv_general_dilated(
            inp, w, window_strides=(1, 1), padding=((pad, pad), (pad, pad)),
            dimension_numbers=("NCHW", "OIHW", "NCHW"),
            precision=jax.lax.Precision.HIGHEST)
        return y + b[None, :, None, None]

    def bn(y, g, be, m, v):
        s = g / jnp.sqrt(v + eps)
        return y * s[None, :, None, None] + (be - m * s)[None, :, None, None]

    y = jax.nn.relu(bn(conv(x, p["w1"], p["b1"], 1), p["g1"], p["be1"], p["m1"], p["v1"]))
    y = bn(conv(y, p["w2"], p["b2"], 1), p["g2"], p["be2"], p["m2"], p["v2"])
    idn = bn(conv(x, p["w3"], p["b3"], 0), p["g3"], p["be3"], p["m3"], p["v3"])
    return jax.nn.relu(y + idn)


if __name__ == "__main__":
    # DoubleConv(in_channels=4, out_channels=8), x: (2, 4, 16, 16)
    B, C_IN, H, W = 2, 4, 16, 16
    C_OUT = 8

    key = jax.random.PRNGKey(0)
    ks = jax.random.split(key, 7)
    x = jax.random.normal(ks[0], (B, C_IN, H, W), jnp.float32)

    lin = lambda a, b: jnp.linspace(a, b, C_OUT, dtype=jnp.float32)
    params = {
        # double_conv: Conv3x3 + BN, ReLU, Conv3x3 + BN   (eval-mode BN running stats)
        "w1": 0.1 * jax.random.normal(ks[1], (C_OUT, C_IN, 3, 3), jnp.float32),
        "b1": 0.05 * jax.random.normal(ks[2], (C_OUT,), jnp.float32),
        "g1": lin(0.8, 1.2), "be1": lin(-0.1, 0.1), "m1": lin(-0.05, 0.05), "v1": lin(0.5, 1.5),
        "w2": 0.1 * jax.random.normal(ks[3], (C_OUT, C_OUT, 3, 3), jnp.float32),
        "b2": 0.05 * jax.random.normal(ks[4], (C_OUT,), jnp.float32),
        "g2": lin(0.9, 1.1), "be2": lin(-0.2, 0.2), "m2": lin(-0.1, 0.1), "v2": lin(0.6, 1.4),
        # identity: Conv1x1 + BN
        "w3": 0.1 * jax.random.normal(ks[5], (C_OUT, C_IN, 1, 1), jnp.float32),
        "b3": 0.05 * jax.random.normal(ks[6], (C_OUT,), jnp.float32),
        "g3": lin(0.7, 1.3), "be3": lin(-0.15, 0.15), "m3": lin(-0.08, 0.08), "v3": lin(0.7, 1.3),
    }
    # TODO(synk): training-mode BatchNorm2d (batch stats + running-stat update) is not
    # implemented; the kernel implements eval-mode BN folded into the conv weights.

    out = jax.jit(double_conv)(x, params)
    out = jax.block_until_ready(out)

    ref = jax.block_until_ready(double_conv_ref(x, params))

    assert out.shape == (B, C_OUT, H, W), out.shape
    # Kernel runs bf16 MXU operands (f32 accumulate) per the perf review; reference is f32
    # HIGHEST, hence the slightly widened tolerance.
    assert jnp.allclose(out, ref, atol=3e-2, rtol=3e-2), \
        f"max abs err {jnp.max(jnp.abs(out - ref))}"

    print("KERNEL_OK")
</pallas_src>

<mosaic_0001>
module attributes {stable_mosaic.version = 11 : i64} {
  func.func @_double_conv_kernel(%arg0: i32, %arg1: memref<32x192xbf16, #tpu.memory_space<vmem>>, %arg2: memref<192x256xbf16, #tpu.memory_space<vmem>>, %arg3: memref<3x128x128xbf16, #tpu.memory_space<vmem>>, %arg4: memref<3x128xf32, #tpu.memory_space<vmem>>, %arg5: memref<32x128xf32, #tpu.memory_space<vmem>>) attributes {dimension_semantics = [#tpu.dimension_semantics<parallel>], iteration_bounds = array<i64: 1>, scalar_prefetch = 0 : i64, scratch_operands = 0 : i64, tpu.core_type = #tpu.core_type<tc>, window_params = [{transform_indices = @transform_0, window_bounds = array<i64: 32, 192>}, {pipeline_mode = #tpu.pipeline_mode<synchronous>, transform_indices = @transform_1, window_bounds = array<i64: 192, 256>}, {pipeline_mode = #tpu.pipeline_mode<synchronous>, transform_indices = @transform_2, window_bounds = array<i64: 3, 128, 128>}, {pipeline_mode = #tpu.pipeline_mode<synchronous>, transform_indices = @transform_3, window_bounds = array<i64: 3, 128>}, {transform_indices = @transform_4, window_bounds = array<i64: 32, 128>}]} {
    %c0 = arith.constant 0 : index
    %c0_0 = arith.constant 0 : index
    %0 = vector.load %arg1[%c0, %c0_0] : memref<32x192xbf16, #tpu.memory_space<vmem>>, vector<32x192xbf16>
    %c0_1 = arith.constant 0 : index
    %c0_2 = arith.constant 0 : index
    %1 = vector.load %arg2[%c0_1, %c0_2] : memref<192x256xbf16, #tpu.memory_space<vmem>>, vector<192x256xbf16>
    %cst = arith.constant dense<0.000000e+00> : vector<32x256xf32>
    %2 = tpu.matmul %0, %1, %cst {dimension_numbers = #tpu.dot_dimension_numbers<[1], [0], [0], [1], [0, 0, 1, 1], [], []>} : vector<32x192xbf16>, vector<192x256xbf16>, vector<32x256xf32> -> vector<32x256xf32>
    %3 = vector.extract_strided_slice %2 {offsets = [0, 0], sizes = [32, 128], strides = [1, 1]} : vector<32x256xf32> to vector<32x128xf32>
    %c0_3 = arith.constant 0 : index
    %c0_4 = arith.constant 0 : index
    %4 = vector.load %arg4[%c0_3, %c0_4] : memref<3x128xf32, #tpu.memory_space<vmem>>, vector<1x128xf32>
    %5 = vector.broadcast %4 : vector<1x128xf32> to vector<32x128xf32>
    %6 = arith.addf %3, %5 : vector<32x128xf32>
    %cst_5 = arith.constant 0.000000e+00 : f32
    %7 = vector.broadcast %cst_5 : f32 to vector<32x128xf32>
    %8 = arith.maximumf %6, %7 : vector<32x128xf32>
    %9 = vector.extract_strided_slice %2 {offsets = [0, 128], sizes = [32, 128], strides = [1, 1]} : vector<32x256xf32> to vector<32x128xf32>
    %c2 = arith.constant 2 : index
    %c0_6 = arith.constant 0 : index
    %10 = vector.load %arg4[%c2, %c0_6] : memref<3x128xf32, #tpu.memory_space<vmem>>, vector<1x128xf32>
    %11 = vector.broadcast %10 : vector<1x128xf32> to vector<32x128xf32>
    %12 = arith.addf %9, %11 : vector<32x128xf32>
    %13 = tpu.iota {dimensions = array<i32: 0>} : vector<32x128xi32>
    %c16_i32 = arith.constant 16 : i32
    %c0_i32 = arith.constant 0 : i32
    %14 = arith.cmpi eq, %c16_i32, %c0_i32 : i32
    %c1_i32 = arith.constant 1 : i32
    %15 = arith.select %14, %c1_i32, %c16_i32 : i32
    %16 = vector.broadcast %15 : i32 to vector<32x128xi32>
    %17 = arith.remsi %13, %16 : vector<32x128xi32>
    %c0_i32_7 = arith.constant 0 : i32
    %18 = vector.broadcast %c0_i32_7 : i32 to vector<32x128xi32>
    %19 = arith.cmpi ne, %17, %18 : vector<32x128xi32>
    %c0_i32_8 = arith.constant 0 : i32
    %20 = vector.broadcast %c0_i32_8 : i32 to vector<32x128xi32>
    %21 = arith.cmpi slt, %17, %20 : vector<32x128xi32>
    %c0_i32_9 = arith.constant 0 : i32
    %22 = arith.cmpi slt, %15, %c0_i32_9 : i32
    %23 = vector.broadcast %22 : i1 to vector<32x128xi1>
    %24 = vector.broadcast %23 : vector<32x128xi1> to vector<32x128xi1>
    %25 = arith.xori %21, %24 : vector<32x128xi1>
    %26 = arith.andi %25, %19 : vector<32x128xi1>
    %27 = vector.broadcast %15 : i32 to vector<32x128xi32>
    %28 = arith.addi %17, %27 : vector<32x128xi32>
    %29 = arith.select %26, %28, %17 : vector<32x128xi1>, vector<32x128xi32>
    %c0_i32_10 = arith.constant 0 : i32
    %30 = vector.broadcast %c0_i32_10 : i32 to vector<32x128xi32>
    %31 = arith.cmpi eq, %29, %30 : vector<32x128xi32>
    %c1_i32_11 = arith.constant 1 : i32
    %32 = tpu.dynamic_rotate %8 by %c1_i32_11 dim 0 : vector<32x128xf32>, i32 -> vector<32x128xf32>
    %cst_12 = arith.constant 0.000000e+00 : f32
    %33 = vector.broadcast %cst_12 : f32 to vector<32x128xf32>
    %34 = arith.select %31, %33, %32 : vector<32x128xi1>, vector<32x128xf32>
    %c16_i32_13 = arith.constant 16 : i32
    %c0_i32_14 = arith.constant 0 : i32
    %35 = arith.cmpi eq, %c16_i32_13, %c0_i32_14 : i32
    %c1_i32_15 = arith.constant 1 : i32
    %36 = arith.select %35, %c1_i32_15, %c16_i32_13 : i32
    %37 = vector.broadcast %36 : i32 to vector<32x128xi32>
    %38 = arith.remsi %13, %37 : vector<32x128xi32>
    %c0_i32_16 = arith.constant 0 : i32
    %39 = vector.broadcast %c0_i32_16 : i32 to vector<32x128xi32>
    %40 = arith.cmpi ne, %38, %39 : vector<32x128xi32>
    %c0_i32_17 = arith.constant 0 : i32
    %41 = vector.broadcast %c0_i32_17 : i32 to vector<32x128xi32>
    %42 = arith.cmpi slt, %38, %41 : vector<32x128xi32>
    %c0_i32_18 = arith.constant 0 : i32
    %43 = arith.cmpi slt, %36, %c0_i32_18 : i32
    %44 = vector.broadcast %43 : i1 to vector<32x128xi1>
    %45 = vector.broadcast %44 : vector<32x128xi1> to vector<32x128xi1>
    %46 = arith.xori %42, %45 : vector<32x128xi1>
    %47 = arith.andi %46, %40 : vector<32x128xi1>
    %48 = vector.broadcast %36 : i32 to vector<32x128xi32>
    %49 = arith.addi %38, %48 : vector<32x128xi32>
    %50 = arith.select %47, %49, %38 : vector<32x128xi1>, vector<32x128xi32>
    %c15_i32 = arith.constant 15 : i32
    %51 = vector.broadcast %c15_i32 : i32 to vector<32x128xi32>
    %52 = arith.cmpi eq, %50, %51 : vector<32x128xi32>
    %c31_i32 = arith.constant 31 : i32
    %53 = tpu.dynamic_rotate %8 by %c31_i32 dim 0 : vector<32x128xf32>, i32 -> vector<32x128xf32>
    %cst_19 = arith.constant 0.000000e+00 : f32
    %54 = vector.broadcast %cst_19 : f32 to vector<32x128xf32>
    %55 = arith.select %52, %54, %53 : vector<32x128xi1>, vector<32x128xf32>
    %c1 = arith.constant 1 : index
    %c0_20 = arith.constant 0 : index
    %56 = vector.load %arg4[%c1, %c0_20] : memref<3x128xf32, #tpu.memory_space<vmem>>, vector<1x128xf32>
    %57 = arith.truncf %34 : vector<32x128xf32> to vector<32x128xbf16>
    %c0_21 = arith.constant 0 : index
    %c0_22 = arith.constant 0 : index
    %c0_23 = arith.constant 0 : index
    %58 = vector.load %arg3[%c0_21, %c0_22, %c0_23] : memref<3x128x128xbf16, #tpu.memory_space<vmem>>, vector<1x128x128xbf16>
    %59 = vector.shape_cast %58 : vector<1x128x128xbf16> to vector<128x128xbf16>
    %cst_24 = arith.constant dense<0.000000e+00> : vector<32x128xf32>
    %60 = tpu.matmul %57, %59, %cst_24 {dimension_numbers = #tpu.dot_dimension_numbers<[1], [0], [0], [1], [0, 0, 1, 1], [], []>} : vector<32x128xbf16>, vector<128x128xbf16>, vector<32x128xf32> -> vector<32x128xf32>
    %61 = vector.broadcast %56 : vector<1x128xf32> to vector<32x128xf32>
    %62 = arith.addf %61, %60 : vector<32x128xf32>
    %63 = arith.truncf %8 : vector<32x128xf32> to vector<32x128xbf16>
    %c1_25 = arith.constant 1 : index
    %c0_26 = arith.constant 0 : index
    %c0_27 = arith.constant 0 : index
    %64 = vector.load %arg3[%c1_25, %c0_26, %c0_27] : memref<3x128x128xbf16, #tpu.memory_space<vmem>>, vector<1x128x128xbf16>
    %65 = vector.shape_cast %64 : vector<1x128x128xbf16> to vector<128x128xbf16>
    %cst_28 = arith.constant dense<0.000000e+00> : vector<32x128xf32>
    %66 = tpu.matmul %63, %65, %cst_28 {dimension_numbers = #tpu.dot_dimension_numbers<[1], [0], [0], [1], [0, 0, 1, 1], [], []>} : vector<32x128xbf16>, vector<128x128xbf16>, vector<32x128xf32> -> vector<32x128xf32>
    %67 = arith.addf %62, %66 : vector<32x128xf32>
    %68 = arith.truncf %55 : vector<32x128xf32> to vector<32x128xbf16>
    %c2_29 = arith.constant 2 : index
    %c0_30 = arith.constant 0 : index
    %c0_31 = arith.constant 0 : index
    %69 = vector.load %arg3[%c2_29, %c0_30, %c0_31] : memref<3x128x128xbf16, #tpu.memory_space<vmem>>, vector<1x128x128xbf16>
    %70 = vector.shape_cast %69 : vector<1x128x128xbf16> to vector<128x128xbf16>
    %cst_32 = arith.constant dense<0.000000e+00> : vector<32x128xf32>
    %71 = tpu.matmul %68, %70, %cst_32 {dimension_numbers = #tpu.dot_dimension_numbers<[1], [0], [0], [1], [0, 0, 1, 1], [], []>} : vector<32x128xbf16>, vector<128x128xbf16>, vector<32x128xf32> -> vector<32x128xf32>
    %72 = arith.addf %67, %71 : vector<32x128xf32>
    %73 = arith.addf %72, %12 : vector<32x128xf32>
    %cst_33 = arith.constant 0.000000e+00 : f32
    %74 = vector.broadcast %cst_33 : f32 to vector<32x128xf32>
    %75 = arith.maximumf %73, %74 : vector<32x128xf32>
    %c0_34 = arith.constant 0 : index
    %c0_35 = arith.constant 0 : index
    %76 = vector.load %arg5[%c0_34, %c0_35] : memref<32x128xf32, #tpu.memory_space<vmem>>, vector<32x128xf32>
    tpu.vector_store %arg5[%c0_34, %c0_35], %75 {strides = array<i32>} : memref<32x128xf32, #tpu.memory_space<vmem>>, vector<32x128xf32>,
    return
  }
  func.func @transform_0(%arg0: i32) -> (i32, i32) {
    %c0_i32 = arith.constant 0 : i32
    %c0_i32_0 = arith.constant 0 : i32
    return %arg0, %c0_i32 : i32, i32
  }
  func.func @transform_1(%arg0: i32) -> (i32, i32) {
    %c0_i32 = arith.constant 0 : i32
    %c0_i32_0 = arith.constant 0 : i32
    %c0_i32_1 = arith.constant 0 : i32
    return %c0_i32, %c0_i32_0 : i32, i32
  }
  func.func @transform_2(%arg0: i32) -> (i32, i32, i32) {
    %c0_i32 = arith.constant 0 : i32
    %c0_i32_0 = arith.constant 0 : i32
    %c0_i32_1 = arith.constant 0 : i32
    %c0_i32_2 = arith.constant 0 : i32
    return %c0_i32, %c0_i32_0, %c0_i32_1 : i32, i32, i32
  }
  func.func @transform_3(%arg0: i32) -> (i32, i32) {
    %c0_i32 = arith.constant 0 : i32
    %c0_i32_0 = arith.constant 0 : i32
    %c0_i32_1 = arith.constant 0 : i32
    return %c0_i32, %c0_i32_0 : i32, i32
  }
  func.func @transform_4(%arg0: i32) -> (i32, i32) {
    %c0_i32 = arith.constant 0 : i32
    %c0_i32_0 = arith.constant 0 : i32
    return %arg0, %c0_i32 : i32, i32
  }
}

</mosaic_0001>

<bundles_post_ra>
// kernel: tile.18
= control target key start
LH: loop header
LB: loop body
LE: loop exit
PB: predicated region body
PF: predicated region fallthrough
CT: control target
= control target key end

     0   :  { %s28_s0 = inlined_call_operand.vmem [shape: f32[8], index: 0, kind: input, shape index: {}]   ;;  %s29_s1 = inlined_call_operand.vmem [shape: f32[16,8], index: 1, kind: output, shape index: {}]  }
   0x1   :  { %v4_v0 = vld [vmem:[%s28_s0] ss:$0 sm:$0xff] }
   0x2   :  { %5 = vst [vmem:[%s29_s1] sm:$0xff] %v4_v0  ;;  %8 = vst [vmem:[%s29_s1 + $0x8] sm:$0xff] %v4_v0 }

// kernel: tile.27
= control target key start
LH: loop header
LB: loop body
LE: loop exit
PB: predicated region body
PF: predicated region fallthrough
CT: control target
= control target key end

     0   :  { %s131_s10 = smov 120   ;;  %s132_s11 = smov 104   ;;  %vm3_vm0 = vcmask 64512   ;;  %vm9_vm1 = vcmask 1048512   ;;  %vm15_vm2 = vcmask 982912   ;;  %vm21_vm3 = vcmask 917312   ;;  %s207_s0 = inlined_call_operand.vmem [shape: f32[16,8], index: 0, kind: input, shape index: {}]   ;;  %s208_s1 = inlined_call_operand.vmem [shape: f32[1,128], index: 1, kind: output, shape index: {}]  }
   0x1   :  { %v101_v0 = vld [vmem:[%s207_s0 + $0xf] sm:$0x1]   ;;  %v103_v1 = vld [vmem:[%s207_s0 + $0xd] sm:$0x1]   ;;  %v102_v2 = vld [vmem:[%s207_s0 + $0xe] sm:$0x1]  }
   0x2   :  { %7 = vrot.lane.b32.xlu0 %v101_v0, %s131_s10  ;;  %19 = vrot.lane.b32.xlu1 %v103_v1, %s132_s11  ;;  %v104_v3 = vld [vmem:[%s207_s0 + $0xc] sm:$0x1]   ;;  %s133_s16 = smov 112   ;;  %s134_s17 = smov 96   ;;  %v105_v4 = vld [vmem:[%s207_s0 + $0xb] sm:$0x1]  }
   0x3   :  { %v106_v5 = vld [vmem:[%s207_s0 + $0xa] sm:$0x1]   ;;  %v2_v6 = vld [vmem:[%s207_s0] sm:$0x1]   ;;  %s135_s24 = smov 88   ;;  %s136_s25 = smov 80  }
   0x4   :  { %4 = vst.msk [vmem:[#allocation0] sm:$0x1] %vm3_vm0, %v2_v6   ;;  %v107_v7 = vld [vmem:[%s207_s0 + $0x9] sm:$0x1]   ;;  %v108_v8 = vld [vmem:[%s207_s0 + $0x8] sm:$0x1]  }
   0x5   :  { %s137_s30 = smov 72   ;;  %s138_s2 = smov 64   ;;  %v109_v9 = vld [vmem:[%s207_s0 + $0x7] sm:$0x1]   ;;  %v110_v10 = vld [vmem:[%s207_s0 + $0x6] sm:$0x1]  }
   0x6   :  { %13 = vrot.lane.b32.xlu0 %v102_v2, %s133_s16  ;;  %25 = vrot.lane.b32.xlu1 %v104_v3, %s134_s17  ;;  %s139_s7 = smov 56   ;;  %s140_s8 = smov 48   ;;  %v111_v11 = vld [vmem:[%s207_s0 + $0x5] sm:$0x1]   ;;  %v112_v12 = vld [vmem:[%s207_s0 + $0x4] sm:$0x1]  }
   0x7   :  { %s141_s13 = smov 40   ;;  %s142_s14 = smov 32   ;;  %v113_v13 = vld [vmem:[%s207_s0 + $0x3] sm:$0x1]   ;;  %v114_v14 = vld [vmem:[%s207_s0 + $0x2] sm:$0x1]  }
   0x8   :  { %s143_s19 = smov 24   ;;  %s144_s20 = smov 16   ;;  %v115_v15 = vld [vmem:[%s207_s0 + $0x1] sm:$0x1]   ;;  %vm27_vm4 = vcmask 851712   ;;  %vm33_vm5 = vcmask 786112  }
   0x9   :  { %s145_s0 = smov 8   ;;  %vm39_vm6 = vcmask 720512   ;;  %vm45_vm7 = vcmask 654912   ;;  %vm51_vm8 = vcmask 589312   ;;  %vm57_vm9 = vcmask 523712  }
   0xa   :  { %31 = vrot.lane.b32.xlu0 %v105_v4, %s135_s24  ;;  %37 = vrot.lane.b32.xlu1 %v106_v5, %s136_s25  ;;  %vm63_vm10 = vcmask 458112   ;;  %vm69_vm11 = vcmask 392512   ;;  %vm75_vm12 = vcmask 326912   ;;  %vm81_vm13 = vcmask 261312  }
   0xb   :  { %vm87_vm14 = vcmask 195712   ;;  %vm93_vm15 = vcmask 130112  }
   0xe   :  { %43 = vrot.lane.b32.xlu0 %v107_v7, %s137_s30  ;;  %49 = vrot.lane.b32.xlu1 %v108_v8, %s138_s2 }
  0x12   :  { %55 = vrot.lane.b32.xlu0 %v109_v9, %s139_s7  ;;  %61 = vrot.lane.b32.xlu1 %v110_v10, %s140_s8 }
  0x16   :  { %67 = vrot.lane.b32.xlu0 %v111_v11, %s141_s13  ;;  %73 = vrot.lane.b32.xlu1 %v112_v12, %s142_s14 }
  0x1a   :  { %79 = vrot.lane.b32.xlu0 %v113_v13, %s143_s19  ;;  %85 = vrot.lane.b32.xlu1 %v114_v14, %s144_s20 }
  0x1e   :  { %91 = vrot.lane.b32.xlu0 %v115_v15, %s145_s0 }
  0x74   :  { %v8_v16 = vpop.permute.xlu0 %7   ;;  %v20_v17 = vpop.permute.xlu1 %19  }
  0x75   :  { %10 = vst.msk [vmem:[#allocation0] sm:$0x1] %vm9_vm1, %v8_v16  }
  0x78   :  { %v14_v18 = vpop.permute.xlu0 %13   ;;  %v26_v19 = vpop.permute.xlu1 %25  }
  0x79   :  { %16 = vst.msk [vmem:[#allocation0] sm:$0x1] %vm15_vm2, %v14_v18  }
  0x7a   :  { %22 = vst.msk [vmem:[#allocation0] sm:$0x1] %vm21_vm3, %v20_v17  }
  0x7b   :  { %28 = vst.msk [vmem:[#allocation0] sm:$0x1] %vm27_vm4, %v26_v19  }
  0x7c   :  { %v32_v20 = vpop.permute.xlu0 %31   ;;  %v38_v21 = vpop.permute.xlu1 %37  }
  0x7d   :  { %34 = vst.msk [vmem:[#allocation0] sm:$0x1] %vm33_vm5, %v32_v20  }
  0x7e   :  { %40 = vst.msk [vmem:[#allocation0] sm:$0x1] %vm39_vm6, %v38_v21  }
  0x80   :  { %v44_v22 = vpop.permute.xlu0 %43   ;;  %v50_v23 = vpop.permute.xlu1 %49  }
  0x81   :  { %46 = vst.msk [vmem:[#allocation0] sm:$0x1] %vm45_vm7, %v44_v22  }
  0x82   :  { %52 = vst.msk [vmem:[#allocation0] sm:$0x1] %vm51_vm8, %v50_v23  }
  0x84   :  { %v56_v24 = vpop.permute.xlu0 %55   ;;  %v62_v25 = vpop.permute.xlu1 %61  }
  0x85   :  { %58 = vst.msk [vmem:[#allocation0] sm:$0x1] %vm57_vm9, %v56_v24  }
  0x86   :  { %64 = vst.msk [vmem:[#allocation0] sm:$0x1] %vm63_vm10, %v62_v25  }
  0x88   :  { %v68_v26 = vpop.permute.xlu0 %67   ;;  %v74_v27 = vpop.permute.xlu1 %73  }
  0x89   :  { %70 = vst.msk [vmem:[#allocation0] sm:$0x1] %vm69_vm11, %v68_v26  }
  0x8a   :  { %76 = vst.msk [vmem:[#allocation0] sm:$0x1] %vm75_vm12, %v74_v27  }
  0x8c   :  { %v80_v28 = vpop.permute.xlu0 %79   ;;  %v86_v29 = vpop.permute.xlu1 %85  }
  0x8d   :  { %82 = vst.msk [vmem:[#allocation0] sm:$0x1] %vm81_vm13, %v80_v28  }
  0x8e   :  { %88 = vst.msk [vmem:[#allocation0] sm:$0x1] %vm87_vm14, %v86_v29  }
  0x90   :  { %v92_v30 = vpop.permute.xlu0 %91  }
  0x91   :  { %94 = vst.msk [vmem:[#allocation0] sm:$0x1] %vm93_vm15, %v92_v30  }
  0x98   :  { %v98_v31 = vld [vmem:[#allocation0] sm:$0x1] }
  0x99   :  { %100 = vst [vmem:[%s208_s1] sm:$0x1] %v98_v31 }

// kernel: double_conv.1
= control target key start
LH: loop header
LB: loop body
LE: loop exit
PB: predicated region body
PF: predicated region fallthrough
CT: control target
= control target key end

     0   :  { %vm184_vm0 = vcmask 523264   ;;  %v266_v46 = vlaneseq  ;;  %vm1011_vm5 = vmmov 1   ;;  %s1266_s1 = inlined_call_operand.vmem [shape: bf16[192,256], index: 1, kind: input, shape index: {}]   ;;  %s1267_s0 = inlined_call_operand.vmem [shape: bf16[32,192], index: 0, kind: input, shape index: {}]   ;;  %s1268_s2 = inlined_call_operand.vmem [shape: bf16[3,128,128], index: 2, kind: input, shape index: {}]   ;;  %s1269_s3 = inlined_call_operand.vmem [shape: f32[3,128], index: 3, kind: input, shape index: {}]   ;;  %s1270_s4 = inlined_call_operand.vmem [shape: f32[32,128], index: 4, kind: output, shape index: {}]  }
   0x1   :  { %v945_v0 = vld [vmem:[%s1266_s1 + $0x4] ss:$8 sps:$4 sm:$0xff]   ;;  %v947_v1 = vld [vmem:[%s1266_s1] ss:$8 sps:$4 sm:$0xff]   ;;  %v948_v2 = vld [vmem:[%s1266_s1 + $0x14] ss:$8 sps:$4 sm:$0xff]  }
   0x2   :  { %191 = vmatprep.subr.bf16.mxu0 %v945_v0  ;;  %v950_v3 = vld [vmem:[%s1266_s1 + $0x10] ss:$8 sps:$4 sm:$0xff]   ;;  %v951_v4 = vld [vmem:[%s1266_s1 + $0x24] ss:$8 sps:$4 sm:$0xff]   ;;  %v953_v5 = vld [vmem:[%s1266_s1 + $0x20] ss:$8 sps:$4 sm:$0xff]  }
   0x3   :  { %192 = vmatpush1.bf16.msra.mxu0 %v947_v1  ;;  %v954_v6 = vld [vmem:[%s1266_s1 + $0x34] ss:$8 sps:$4 sm:$0xff]   ;;  %v956_v7 = vld [vmem:[%s1266_s1 + $0x30] ss:$8 sps:$4 sm:$0xff]   ;;  %v957_v8 = vld [vmem:[%s1266_s1 + $0x44] ss:$8 sps:$4 sm:$0xff]  }
   0x4   :  { %193 = vmatprep.subr.bf16.mxu0 %v948_v2  ;;  %v959_v9 = vld [vmem:[%s1266_s1 + $0x40] ss:$8 sps:$4 sm:$0xff]   ;;  %v960_v10 = vld [vmem:[%s1266_s1 + $0x54] ss:$8 sps:$4 sm:$0xff]   ;;  %v983_v11 = vld [vmem:[%s1267_s0 + $0x4] ss:$8 sps:$4 sm:$0xff]  }
   0x5   :  { %v962_v12 = vld [vmem:[%s1266_s1 + $0x50] ss:$8 sps:$4 sm:$0xff]   ;;  %v963_v13 = vld [vmem:[%s1266_s1 + $0x64] ss:$8 sps:$4 sm:$0xff]   ;;  %761 = vmatprep.mubr.msk.bf16.mxu0 %vm184_vm0, %v983_v11  ;;  %v965_v16 = vld [vmem:[%s1266_s1 + $0x60] ss:$8 sps:$4 sm:$0xff]  }
   0x6   :  { %v987_v14 = vld [vmem:[%s1268_s2 + $0x40] sm:$0xff]   ;;  %v988_v15 = vld [vmem:[%s1268_s2 + $0x48] sm:$0xff]   ;;  %v990_v17 = vld [vmem:[%s1268_s2 + $0x50] sm:$0xff]   ;;  %v1185_v53 = vshrl.u32 %v266_v46, 7 }
   0x7   :  { %194 = vmatpush1.bf16.msra.mxu0 %v950_v3  ;;  %892 = vmatprep.subr.bf16.mxu1 %v987_v14  ;;  %v966_v18 = vld [vmem:[%s1266_s1 + $0x74] ss:$8 sps:$4 sm:$0xff]   ;;  %v968_v19 = vld [vmem:[%s1266_s1 + $0x70] ss:$8 sps:$4 sm:$0xff]   ;;  %v969_v21 = vld [vmem:[%s1266_s1 + $0x84] ss:$8 sps:$4 sm:$0xff]  }
   0x8   :  { %195 = vmatprep.subr.bf16.mxu0 %v951_v4  ;;  %893 = vmatpush3.bf16.msra.mxu1 %v987_v14  ;;  %v992_v20 = vld [vmem:[%s1268_s2 + $0x58] sm:$0xff]   ;;  %v971_v22 = vld [vmem:[%s1266_s1 + $0x80] ss:$8 sps:$4 sm:$0xff]   ;;  %v975_v25 = vld [vmem:[%s1266_s1 + $0xa4] ss:$8 sps:$4 sm:$0xff]   ;;  %v268_v59 = vadd.s32 8, %v1185_v53 }
   0x9   :  { %894 = vmatprep.subr.bf16.mxu1 %v988_v15  ;;  %v972_v23 = vld [vmem:[%s1266_s1 + $0x94] ss:$8 sps:$4 sm:$0xff]   ;;  %v974_v24 = vld [vmem:[%s1266_s1 + $0x90] ss:$8 sps:$4 sm:$0xff]   ;;  %v977_v26 = vld [vmem:[%s1266_s1 + $0xa0] ss:$8 sps:$4 sm:$0xff]  }
   0xa   :  { %v978_v27 = vld [vmem:[%s1266_s1 + $0xb4] ss:$8 sps:$4 sm:$0xff]   ;;  %v980_v28 = vld [vmem:[%s1266_s1 + $0xb0] ss:$8 sps:$4 sm:$0xff]   ;;  %v989_v29 = vld [vmem:[%s1268_s2] sm:$0xff]   ;;  %vm327_vm1 = vcmp.lt.s32.totalorder %v1185_v53, 1 }
   0xb   :  { %196 = vmatpush1.bf16.msra.mxu0 %v953_v5  ;;  %v981_v30 = vld [vmem:[%s1267_s0] ss:$8 sps:$4 sm:$0xff]   ;;  %v984_v31 = vld [vmem:[%s1267_s0 + $0x14] ss:$8 sps:$4 sm:$0xff]   ;;  %v986_v34 = vld [vmem:[%s1267_s0 + $0x10] ss:$8 sps:$4 sm:$0xff]  }
   0xc   :  { %197 = vmatprep.subr.bf16.mxu0 %v954_v6  ;;  %895 = vmatpush3.bf16.msra.mxu1 %v988_v15  ;;  %v991_v32 = vld [vmem:[%s1268_s2 + $0x8] sm:$0xff]   ;;  %v993_v33 = vld [vmem:[%s1268_s2 + $0x10] sm:$0xff]   ;;  %v994_v35 = vld [vmem:[%s1268_s2 + $0x60] sm:$0xff]   ;;  %vm344_vm2 = vcmp.lt.s32.totalorder %v1185_v53, 7  ;;  %v269_v2 = vadd.s32 16, %v1185_v53  ;;  %v282_v5 = vand.u32 15, %v268_v59 }
   0xd   :  { %896 = vmatprep.subr.bf16.mxu1 %v990_v17  ;;  %v995_v36 = vld [vmem:[%s1268_s2 + $0x18] sm:$0xff]   ;;  %v996_v37 = vld [vmem:[%s1268_s2 + $0x68] sm:$0xff]   ;;  %v997_v38 = vld [vmem:[%s1268_s2 + $0x20] sm:$0xff]  }
   0xe   :  { %v998_v39 = vld [vmem:[%s1268_s2 + $0x70] sm:$0xff]   ;;  %v999_v40 = vld [vmem:[%s1268_s2 + $0x28] sm:$0xff]   ;;  %v1000_v41 = vld [vmem:[%s1268_s2 + $0x78] sm:$0xff]   ;;  %v289_v15 = vand.u32 15, %v269_v2  ;;  %vm840_vm3 = vcmp.ne.s32.totalorder %v282_v5, 15 }
   0xf   :  { %198 = vmatpush1.bf16.msra.mxu0 %v956_v7  ;;  %v1001_v42 = vld [vmem:[%s1268_s2 + $0x30] sm:$0xff]   ;;  %v1171_v43 = vld [vmem:[%s1268_s2 + $0x80] sm:$0xff]   ;;  %v1003_v44 = vld [vmem:[%s1268_s2 + $0x38] sm:$0xff]  }
  0x10   :  { %199 = vmatprep.subr.bf16.mxu0 %v957_v8  ;;  %897 = vmatpush3.bf16.msra.mxu1 %v990_v17  ;;  %v763_v45 = vld [vmem:[%s1269_s3] ss:$0 sm:$0xff]  ;;  %v764_v47 = vld [vmem:[%s1269_s3 + $0x2] ss:$0 sm:$0xff]  ;;  %vm831_vm6 = vmpackc.low %vm840_vm3, %vm1011_vm5  ;;  %vm839_vm7 = vcmp.ne.s32.totalorder %v289_v15, 0 }
  0x11   :  { %898 = vmatprep.subr.bf16.mxu1 %v992_v20  ;;  %vm778_vm9 = vmpackc.low %vm1011_vm5, %vm839_vm7 }
  0x13   :  { %200 = vmatpush1.bf16.msra.mxu0 %v959_v9 }
  0x14   :  { %201 = vmatprep.subr.bf16.mxu0 %v960_v10  ;;  %899 = vmatpush3.bf16.msra.mxu1 %v992_v20  ;;  %v275_v10 = vand.u32 15, %v1185_v53 }
  0x15   :  { %900 = vmatprep.subr.bf16.mxu1 %v994_v35 }
  0x16   :  { %vm1202_vm4 = vcmp.ne.s32.totalorder %v275_v10, 0 }
  0x17   :  { %202 = vmatpush1.bf16.msra.mxu0 %v962_v12  ;;  %vm774_vm8 = vmpackc.low %vm1011_vm5, %vm1202_vm4 }
  0x18   :  { %203 = vmatprep.subr.bf16.mxu0 %v963_v13  ;;  %901 = vmatpush3.bf16.msra.mxu1 %v994_v35  ;;  %v1006_v35 = vld [vmem:[%s1268_s2 + $0x98] sm:$0xff]  }
  0x19   :  { %902 = vmatprep.subr.bf16.mxu1 %v996_v37 }
  0x1b   :  { %204 = vmatpush1.bf16.msra.mxu0 %v965_v16 }
  0x1c   :  { %205 = vmatprep.subr.bf16.mxu0 %v966_v18  ;;  %903 = vmatpush3.bf16.msra.mxu1 %v996_v37  ;;  %v1008_v37 = vld [vmem:[%s1268_s2 + $0xa8] sm:$0xff]  }
  0x1d   :  { %904 = vmatprep.subr.bf16.mxu1 %v998_v39 }
  0x1f   :  { %206 = vmatpush1.bf16.msra.mxu0 %v968_v19 }
  0x20   :  { %207 = vmatprep.subr.bf16.mxu0 %v969_v21  ;;  %905 = vmatpush3.bf16.msra.mxu1 %v998_v39  ;;  %v270_v39 = vadd.s32 24, %v1185_v53 }
  0x21   :  { %906 = vmatprep.subr.bf16.mxu1 %v1000_v41 }
  0x23   :  { %208 = vmatpush1.bf16.msra.mxu0 %v971_v22 }
  0x24   :  { %209 = vmatprep.subr.bf16.mxu0 %v972_v23  ;;  %907 = vmatpush3.bf16.msra.mxu1 %v1000_v41  ;;  %v296_v41 = vand.u32 15, %v270_v39 }
  0x25   :  { %912 = vmatprep.subr.bf16.mxu1 %v1171_v43 }
  0x26   :  { %vm841_vm10 = vcmp.ne.s32.totalorder %v296_v41, 15 }
  0x27   :  { %210 = vmatpush1.bf16.msra.mxu0 %v974_v24  ;;  %v1004_v24 = vld [vmem:[%s1268_s2 + $0x88] sm:$0xff]   ;;  %vm835_vm11 = vmpackc.low %vm841_vm10, %vm1011_vm5 }
  0x28   :  { %211 = vmatprep.subr.bf16.mxu0 %v975_v25 }
  0x2b   :  { %212 = vmatpush1.bf16.msra.mxu0 %v977_v26 }
  0x2c   :  { %213 = vmatprep.subr.bf16.mxu0 %v978_v27 }
  0x2f   :  { %214 = vmatpush1.bf16.msra.mxu0 %v980_v28 }
  0x30   :  { %872 = vmatprep.subr.bf16.mxu0 %v989_v29 }
  0x32   :  { %224 = vmatmul.mubr.bf16.vlgmr.msra.gmra.mrb[0].mxu0 %v981_v30 }
  0x33   :  { %762 = vmatprep.mubr.msk.bf16.mxu0 %vm184_vm0, %v984_v31  ;;  %873 = vmatpush3.bf16.msra.mxu0 %v989_v29 }
  0x34   :  { %874 = vmatprep.subr.bf16.mxu0 %v991_v32 }
  0x37   :  { %875 = vmatpush3.bf16.msra.mxu0 %v991_v32 }
  0x38   :  { %876 = vmatprep.subr.bf16.mxu0 %v993_v33 }
  0x3a   :  { %234 = vmatmul.mubr.bf16.gmra.mrb[4].mxu0 %v986_v34  ;;  %v1005_v34 = vld [vmem:[%s1268_s2 + $0x90] sm:$0xff]  }
  0x3b   :  { %877 = vmatpush3.bf16.msra.mxu0 %v993_v33 }
  0x3c   :  { %878 = vmatprep.subr.bf16.mxu0 %v995_v36 }
  0x3f   :  { %879 = vmatpush3.bf16.msra.mxu0 %v995_v36  ;;  %v1007_v36 = vld [vmem:[%s1268_s2 + $0xa0] sm:$0xff]  }
  0x40   :  { %880 = vmatprep.subr.bf16.mxu0 %v997_v38 }
  0x43   :  { %881 = vmatpush3.bf16.msra.mxu0 %v997_v38  ;;  %v1009_v38 = vld [vmem:[%s1268_s2 + $0xb0] sm:$0xff]  }
  0x44   :  { %882 = vmatprep.subr.bf16.mxu0 %v999_v40 }
  0x47   :  { %883 = vmatpush3.bf16.msra.mxu0 %v999_v40  ;;  %v1010_v40 = vld [vmem:[%s1268_s2 + $0xb8] sm:$0xff]  }
  0x48   :  { %884 = vmatprep.subr.bf16.mxu0 %v1001_v42 }
  0x4b   :  { %885 = vmatpush3.bf16.msra.mxu0 %v1001_v42  ;;  %v781_v42 = vld [vmem:[%s1269_s3 + $0x1] ss:$0 sm:$0xff] }
  0x4c   :  { %886 = vmatprep.subr.bf16.mxu0 %v1003_v44 }
  0x4f   :  { %887 = vmatpush3.bf16.msra.mxu0 %v1003_v44 }
 0x105   :  { %v225_v48 = vpop.f32.mrb[0].mxu0 }
 0x106   :  { %v249_v49 = vadd.f32 %v763_v45, %v225_v48  ;;  %v227_v50 = vpop.f32.mrb[1].mxu0 }
 0x107   :  { %v1183_v51 = vadd.f32 %v764_v47, %v227_v50  ;;  %v229_v52 = vpop.f32.mrb[2].mxu0 }
 0x108   :  { %v253_v54 = vmax.f32 %v249_v49, 0.0  ;;  %v250_v55 = vadd.f32 %v763_v45, %v229_v52  ;;  %v231_v56 = vpop.f32.mrb[3].mxu0 }
 0x109   :  { %v1187_v57 = vadd.f32 %v764_v47, %v231_v56 }
 0x10a   :  { %v254_v58 = vmax.f32 %v250_v55, 0.0  ;;  %v323_v60 = vrot.slane %v253_v54, 7  ;;  %v340_v61 = vrot.slane %v253_v54, 1 }
 0x10c   :  { %v324_v62 = vrot.slane %v254_v58, 7  ;;  %v341_v63 = vrot.slane %v254_v58, 1  ;;  %v477_v0 = vpack.c.bf16 %v254_v58, %v253_v54 }
 0x10d   :  { %v235_v1 = vpop.f32.mrb[4].mxu0 }
 0x10e   :  { %v251_v3 = vadd.f32 %v763_v45, %v235_v1  ;;  %v237_v4 = vpop.f32.mrb[5].mxu0  ;;  %908 = vmatprep.mubr.bf16.mxu1 %v477_v0  ;;  %v347_v6 = vsel %vm344_vm2, %v340_v61, %v341_v63  ;;  %v330_v7 = vsel %vm327_vm1, %v323_v60, %v324_v62 }
 0x10f   :  { %v1197_v8 = vadd.f32 %v764_v47, %v237_v4  ;;  %v239_v9 = vpop.f32.mrb[6].mxu0 }
 0x110   :  { %v255_v11 = vmax.f32 %v251_v3, 0.0  ;;  %v252_v12 = vadd.f32 %v763_v45, %v239_v9  ;;  %v241_v13 = vpop.f32.mrb[7].mxu0 }
 0x111   :  { %v1200_v14 = vadd.f32 %v764_v47, %v241_v13 }
 0x112   :  { %v325_v16 = vrot.slane %v255_v11, 7  ;;  %v342_v17 = vrot.slane %v255_v11, 1  ;;  %v256_v18 = vmax.f32 %v252_v12, 0.0 }
 0x114   :  { %v329_v20 = vsel %vm327_vm1, %v324_v62, %v325_v16  ;;  %v326_v21 = vrot.slane %v256_v18, 7  ;;  %v343_v22 = vrot.slane %v256_v18, 1  ;;  %v478_v23 = vpack.c.bf16 %v256_v18, %v255_v11 }
 0x115   :  { %v346_v25 = vsel %vm344_vm2, %v341_v63, %v342_v17 }
 0x116   :  { %v328_v26 = vsel %vm327_vm1, %v325_v16, %v326_v21  ;;  %v345_v27 = vsel %vm344_vm2, %v342_v17, %v343_v22  ;;  %v348_v28 = vsel %vm344_vm2, %v343_v22, %v340_v61  ;;  %909 = vmatmul.mubr.bf16.vlgmr.msra.gmra.mrb[0].mxu1 %v478_v23  ;;  %v832_v29 = vpack.c.bf16 %v346_v25, %v347_v6 }
 0x117   :  { %v779_v30 = vpack.c.bf16 %v328_v26, %v329_v20  ;;  %v836_v31 = vpack.c.bf16 %v348_v28, %v345_v27  ;;  %913 = vmatpush3.bf16.msra.mxu1 %v1171_v43  ;;  %v331_v32 = vsel %vm327_vm1, %v326_v21, %v323_v60 }
 0x118   :  { %928 = vmatprep.mubr.msk.bf16.mxu1 %vm831_vm6, %v832_v29  ;;  %v775_v33 = vpack.c.bf16 %v330_v7, %v331_v32  ;;  %914 = vmatprep.subr.bf16.mxu1 %v1004_v24 }
 0x11a   :  { %888 = vmatprep.mubr.msk.bf16.mxu0 %vm774_vm8, %v775_v33 }
 0x11b   :  { %889 = vmatmul.mubr.msk.bf16.vlgmr.msra.gmra.mrb[8].mxu0 %vm778_vm9, %v779_v30  ;;  %915 = vmatpush3.bf16.msra.mxu1 %v1004_v24 }
 0x11c   :  { %916 = vmatprep.subr.bf16.mxu1 %v1005_v34 }
 0x11f   :  { %917 = vmatpush3.bf16.msra.mxu1 %v1005_v34 }
 0x120   :  { %918 = vmatprep.subr.bf16.mxu1 %v1006_v35 }
 0x123   :  { %919 = vmatpush3.bf16.msra.mxu1 %v1006_v35 }
 0x124   :  { %920 = vmatprep.subr.bf16.mxu1 %v1007_v36 }
 0x127   :  { %921 = vmatpush3.bf16.msra.mxu1 %v1007_v36 }
 0x128   :  { %922 = vmatprep.subr.bf16.mxu1 %v1008_v37 }
 0x12b   :  { %923 = vmatpush3.bf16.msra.mxu1 %v1008_v37 }
 0x12c   :  { %924 = vmatprep.subr.bf16.mxu1 %v1009_v38 }
 0x12f   :  { %925 = vmatpush3.bf16.msra.mxu1 %v1009_v38 }
 0x130   :  { %926 = vmatprep.subr.bf16.mxu1 %v1010_v40 }
 0x133   :  { %927 = vmatpush3.bf16.msra.mxu1 %v1010_v40 }
 0x136   :  { %929 = vmatmul.mubr.msk.bf16.vlgmr.msra.gmra.mrb[0].mxu1 %vm835_vm11, %v836_v31 }
 0x1ee   :  { %v890_v43 = vpop.f32.mrb[8].mxu0 }
 0x1ef   :  { %v475_v44 = vadd.f32 %v890_v43, %v781_v42  ;;  %v454_v45 = vpop.f32.mrb[9].mxu0 }
 0x1f0   :  { %v473_v46 = vadd.f32 %v781_v42, %v454_v45  ;;  %v891_v47 = vpop.f32.mrb[10].mxu0 }
 0x1f1   :  { %v476_v48 = vadd.f32 %v891_v47, %v781_v42  ;;  %v457_v49 = vpop.f32.mrb[11].mxu0 }
 0x1f2   :  { %v474_v50 = vadd.f32 %v781_v42, %v457_v49 }
 0x209   :  { %v930_v52 = vpop.f32.mrb[0].mxu1 }
 0x20a   :  { %v933_v53 = vadd.f32 %v930_v52, %v475_v44  ;;  %v698_v54 = vpop.f32.mrb[1].mxu1 }
 0x20b   :  { %v935_v55 = vadd.f32 %v698_v54, %v473_v46  ;;  %v931_v56 = vpop.f32.mrb[2].mxu1 }
 0x20c   :  { %v719_v58 = vadd.f32 %v933_v53, %v1197_v8  ;;  %v937_v59 = vadd.f32 %v931_v56, %v476_v48  ;;  %v701_v60 = vpop.f32.mrb[3].mxu1 }
 0x20d   :  { %v717_v61 = vadd.f32 %v935_v55, %v1183_v51  ;;  %v939_v62 = vadd.f32 %v701_v60, %v474_v50 }
 0x20e   :  { %v723_v63 = vmax.f32 %v719_v58, 0.0  ;;  %v720_v0 = vadd.f32 %v937_v59, %v1200_v14 }
 0x20f   :  { %v721_v1 = vmax.f32 %v717_v61, 0.0  ;;  %v718_v2 = vadd.f32 %v939_v62, %v1187_v57 }
 0x210   :  { %727 = vst [vmem:[%s1270_s4 + $0x10] sm:$0xff] %v723_v63  ;;  %v724_v3 = vmax.f32 %v720_v0, 0.0 }
 0x211   :  { %725 = vst [vmem:[%s1270_s4] sm:$0xff] %v721_v1  ;;  %v722_v4 = vmax.f32 %v718_v2, 0.0 }
 0x212   :  { %728 = vst [vmem:[%s1270_s4 + $0x18] sm:$0xff] %v724_v3 }
 0x213   :  { %726 = vst [vmem:[%s1270_s4 + $0x8] sm:$0xff] %v722_v4 }

</bundles_post_ra>
